<compile_context>
chip_gen: v6e
topology: v6e:2x2x1
jax: 0.10.0
libtpu: 0.0.40
codegen_flags: <defaults>
</compile_context>

<pallas_src>
import functools

import jax
import jax.numpy as jnp
from jax.experimental import pallas as pl
from jax.experimental.pallas import tpu as pltpu


# -----------------------------------------------------------------------------
# Activation (exact GELU, matching torch.nn.GELU() default)
# -----------------------------------------------------------------------------
_INV_SQRT2 = 0.7071067811865476


def _erf(z):
    """Abramowitz & Stegun 7.1.26 polynomial erf, |error| < 1.5e-7 (f32)."""
    a1, a2, a3, a4, a5 = (0.254829592, -0.284496736, 1.421413741,
                          -1.453152027, 1.061405429)
    p = 0.3275911
    za = jnp.abs(z)
    t = 1.0 / (1.0 + p * za)
    poly = ((((a5 * t + a4) * t + a3) * t + a2) * t + a1) * t
    y = 1.0 - poly * jnp.exp(-za * za)
    return jnp.where(z < 0.0, -y, y)


def _gelu_exact(h):
    """Exact (erf-form) GELU in f32."""
    return 0.5 * h * (1.0 + _erf(h * _INV_SQRT2))


# -----------------------------------------------------------------------------
# Kernels
# -----------------------------------------------------------------------------
def _cls_head_mlp_kernel(x_ref, w1_ref, b1_ref, w2_ref, b2_ref, o_ref, *,
                         activation):
    """Fused Linear -> activation -> (dropout=identity) -> Linear(->1)."""
    x = x_ref[...]
    # (TM, D) @ (D, H) on the MXU, f32 accumulation. W1/b1 are VMEM-resident.
    h = jnp.dot(x, w1_ref[...], preferred_element_type=jnp.float32)
    h = h + b1_ref[...].astype(jnp.float32)           # (1, H) broadcast
    h = activation(h)                                 # stays f32, no downcast
    # Final Linear(H, 1): VPU multiply + lane (XLU) reduce instead of an N=1
    # MXU matmul.
    w2 = w2_ref[...].astype(jnp.float32)               # (1, H)
    logit = jnp.sum(h * w2, axis=-1, keepdims=True)    # (TM, 1)
    o_ref[...] = (logit + b2_ref[0, 0]).astype(o_ref.dtype)


def _cls_head_linear_kernel(x_ref, w2_ref, b2_ref, o_ref):
    """hidden_dim=None path: single Linear(input_dim, 1) as a VPU reduce."""
    x = x_ref[...].astype(jnp.float32)
    w2 = w2_ref[...].astype(jnp.float32)                # (1, D)
    logit = jnp.sum(x * w2, axis=-1, keepdims=True)     # (TM, 1)
    o_ref[...] = (logit + b2_ref[0, 0]).astype(o_ref.dtype)


# -----------------------------------------------------------------------------
# Wrapper
# -----------------------------------------------------------------------------
def _round_up(n: int, m: int) -> int:
    return (n + m - 1) // m * m


def classification_head_cls(x, params, hidden_dim=None, *, activation=None,
                            block_m=512):
    """ClassificationHeadCLS forward pass as one Pallas TPU kernel.

    x: (B, input_dim). params: 'w2' (last_in, 1), 'b2' (1, 1) and, if
    hidden_dim is given, 'w1' (input_dim, hidden_dim), 'b1' (1, hidden_dim).
    Returns (B, 1) in x.dtype.
    """
    if activation is None:
        activation = _gelu_exact

    B, D = x.shape
    out_dtype = x.dtype
    elt = x.dtype.itemsize

    # Batch tile: multiple of 8 (sublane), at most block_m; pad B up to it.
    tm = min(_round_up(block_m, 8), _round_up(B, 8))
    b_pad = _round_up(B, tm)
    if b_pad != B:
        x = jnp.pad(x, ((0, b_pad - B), (0, 0)))
    grid = (b_pad // tm,)

    b2 = params["b2"].reshape(1, 1).astype(jnp.float32)   # SMEM scalar

    if hidden_dim is None:
        w2_row = params["w2"].reshape(1, D)
        kernel = _cls_head_linear_kernel
        in_specs = [
            pl.BlockSpec((tm, D), lambda i: (i, 0)),            # x tile
            pl.BlockSpec((1, D), lambda i: (0, 0)),             # resident W2
            pl.BlockSpec(memory_space=pltpu.MemorySpace.SMEM),  # b2 scalar
        ]
        args = (x, w2_row, b2)
        resident_bytes = w2_row.size * w2_row.dtype.itemsize
        tmp_bytes = 4 * tm * D * 4
        flops = 2 * b_pad * D
        transcendentals = 0
    else:
        H = hidden_dim
        w1 = params["w1"]
        b1 = params["b1"].reshape(1, H)
        w2_row = params["w2"].reshape(1, H)
        kernel = functools.partial(_cls_head_mlp_kernel, activation=activation)
        in_specs = [
            pl.BlockSpec((tm, D), lambda i: (i, 0)),            # x tile
            pl.BlockSpec((D, H), lambda i: (0, 0)),             # resident W1
            pl.BlockSpec((1, H), lambda i: (0, 0)),             # resident b1
            pl.BlockSpec((1, H), lambda i: (0, 0)),             # resident W2
            pl.BlockSpec(memory_space=pltpu.MemorySpace.SMEM),  # b2 scalar
        ]
        args = (x, w1, b1, w2_row, b2)
        resident_bytes = sum(a.size * a.dtype.itemsize for a in (w1, b1, w2_row))
        tmp_bytes = 6 * tm * H * 4
        flops = 2 * b_pad * D * H + 2 * b_pad * H
        transcendentals = b_pad * H

    bytes_accessed = sum(a.size * a.dtype.itemsize for a in args) + b_pad * elt
    vmem_limit = (2 * tm * D * elt        # double-buffered x tiles
                  + 2 * tm * elt          # double-buffered out tiles
                  + 2 * resident_bytes    # resident weights (+ margin)
                  + tmp_bytes             # f32 intermediates headroom
                  + (2 << 20))            # compiler scratch headroom
    vmem_limit = int(min(max(vmem_limit, 4 << 20), 128 << 20))

    out = pl.pallas_call(
        kernel,
        out_shape=jax.ShapeDtypeStruct((b_pad, 1), out_dtype),
        grid=grid,
        in_specs=in_specs,
        out_specs=pl.BlockSpec((tm, 1), lambda i: (i, 0)),
        compiler_params=pltpu.CompilerParams(
            dimension_semantics=("parallel",),
            vmem_limit_bytes=vmem_limit),
        cost_estimate=pl.CostEstimate(
            flops=int(flops),
            transcendentals=int(transcendentals),
            bytes_accessed=int(bytes_accessed)),
    )(*args)
    return out[:B]


# -----------------------------------------------------------------------------
# Params + pure-JAX reference
# -----------------------------------------------------------------------------
def init_params(key, input_dim, hidden_dim, dtype=jnp.float32):
    """Deterministic synthetic parameter init (shapes match nn.Linear)."""
    params = {}
    k1, k2, k3, k4 = jax.random.split(key, 4)
    if hidden_dim is not None:
        bound1 = 1.0 / jnp.sqrt(input_dim)
        params["w1"] = jax.random.uniform(
            k1, (input_dim, hidden_dim), dtype, -bound1, bound1)
        params["b1"] = jax.random.uniform(
            k2, (1, hidden_dim), dtype, -bound1, bound1)
        last_in = hidden_dim
    else:
        last_in = input_dim
    bound2 = 1.0 / jnp.sqrt(last_in)
    params["w2"] = jax.random.uniform(k3, (last_in, 1), dtype, -bound2, bound2)
    params["b2"] = jax.random.uniform(k4, (1, 1), dtype, -bound2, bound2)
    return params


def reference_forward(x, params, hidden_dim=None):
    """Pure-JAX reference (exact-erf GELU, matching torch.nn.GELU())."""
    h = x
    if hidden_dim is not None:
        h = jax.nn.gelu(h @ params["w1"] + params["b1"], approximate=False)
    # High-precision final projection so the reference does not add its own
    # matmul rounding into the comparison with the kernel's f32 reduce.
    return (jnp.dot(h, params["w2"], precision=jax.lax.Precision.HIGHEST)
            + params["b2"])


# -----------------------------------------------------------------------------
# Main
# -----------------------------------------------------------------------------
if __name__ == "__main__":
    key = jax.random.PRNGKey(0)
    k_x1, k_x2, k_p1, k_p2 = jax.random.split(key, 4)

    # Case 1: MLP head (Linear -> GELU(exact) -> Dropout(eval) -> Linear(1)).
    # Batch > tile so the grid / padding / resident-weight path is exercised.
    B1, D1, H1 = 200, 256, 128
    x1 = jax.random.normal(k_x1, (B1, D1), jnp.float32)
    params_mlp = init_params(k_p1, D1, H1)
    out_mlp = jax.block_until_ready(
        classification_head_cls(x1, params_mlp, hidden_dim=H1, block_m=128))
    ref_mlp = reference_forward(x1, params_mlp, hidden_dim=H1)
    assert out_mlp.shape == (B1, 1)
    assert jnp.allclose(out_mlp, ref_mlp, atol=1e-4, rtol=1e-4), (
        "MLP path mismatch, max abs diff = "
        f"{float(jnp.max(jnp.abs(out_mlp - ref_mlp)))}")

    # Case 2: default hidden_dim=None (single Linear(input_dim, 1)).
    B2, D2 = 8, 32
    x2 = jax.random.normal(k_x2, (B2, D2), jnp.float32)
    params_lin = init_params(k_p2, D2, None)
    out_lin = jax.block_until_ready(
        classification_head_cls(x2, params_lin, hidden_dim=None))
    ref_lin = reference_forward(x2, params_lin, hidden_dim=None)
    assert out_lin.shape == (B2, 1)
    assert jnp.allclose(out_lin, ref_lin, atol=1e-4, rtol=1e-4), (
        "Linear path mismatch, max abs diff = "
        f"{float(jnp.max(jnp.abs(out_lin - ref_lin)))}")

    print("KERNEL_OK")
</pallas_src>

<mosaic_0001>
module attributes {stable_mosaic.version = 11 : i64} {
  func.func @_cls_head_mlp_kernel(%arg0: i32, %arg1: memref<128x256xf32, #tpu.memory_space<vmem>>, %arg2: memref<256x128xf32, #tpu.memory_space<vmem>>, %arg3: memref<1x128xf32, #tpu.memory_space<vmem>>, %arg4: memref<1x128xf32, #tpu.memory_space<vmem>>, %arg5: memref<1x1xf32, #tpu.memory_space<smem>>, %arg6: memref<128x1xf32, #tpu.memory_space<vmem>>) attributes {dimension_semantics = [#tpu.dimension_semantics<parallel>], iteration_bounds = array<i64: 2>, scalar_prefetch = 0 : i64, scratch_operands = 0 : i64, tpu.core_type = #tpu.core_type<tc>, window_params = [{transform_indices = @transform_0, window_bounds = array<i64: 128, 256>}, {pipeline_mode = #tpu.pipeline_mode<synchronous>, transform_indices = @transform_1, window_bounds = array<i64: 256, 128>}, {pipeline_mode = #tpu.pipeline_mode<synchronous>, transform_indices = @transform_2, window_bounds = array<i64: 1, 128>}, {pipeline_mode = #tpu.pipeline_mode<synchronous>, transform_indices = @transform_3, window_bounds = array<i64: 1, 128>}, {transform_indices = @transform_4, window_bounds = array<i64: 1, 1>}, {transform_indices = @transform_5, window_bounds = array<i64: 128, 1>}]} {
    %c0 = arith.constant 0 : index
    %c0_0 = arith.constant 0 : index
    %0 = vector.load %arg1[%c0, %c0_0] : memref<128x256xf32, #tpu.memory_space<vmem>>, vector<128x256xf32>
    %c0_1 = arith.constant 0 : index
    %c0_2 = arith.constant 0 : index
    %1 = vector.load %arg2[%c0_1, %c0_2] : memref<256x128xf32, #tpu.memory_space<vmem>>, vector<256x128xf32>
    %cst = arith.constant dense<0.000000e+00> : vector<128x128xf32>
    %2 = tpu.matmul %0, %1, %cst {dimension_numbers = #tpu.dot_dimension_numbers<[1], [0], [0], [1], [0, 0, 1, 1], [], []>} : vector<128x256xf32>, vector<256x128xf32>, vector<128x128xf32> -> vector<128x128xf32>
    %c0_3 = arith.constant 0 : index
    %c0_4 = arith.constant 0 : index
    %3 = vector.load %arg3[%c0_3, %c0_4] : memref<1x128xf32, #tpu.memory_space<vmem>>, vector<1x128xf32>
    %4 = vector.broadcast %3 : vector<1x128xf32> to vector<128x128xf32>
    %5 = arith.addf %2, %4 : vector<128x128xf32>
    %cst_5 = arith.constant 5.000000e-01 : f32
    %6 = vector.broadcast %cst_5 : f32 to vector<128x128xf32>
    %7 = arith.mulf %6, %5 : vector<128x128xf32>
    %cst_6 = arith.constant 0.707106769 : f32
    %8 = vector.broadcast %cst_6 : f32 to vector<128x128xf32>
    %9 = arith.mulf %5, %8 : vector<128x128xf32>
    %10 = math.absf %9 : vector<128x128xf32>
    %cst_7 = arith.constant 0.327591091 : f32
    %11 = vector.broadcast %cst_7 : f32 to vector<128x128xf32>
    %12 = arith.mulf %11, %10 : vector<128x128xf32>
    %cst_8 = arith.constant 1.000000e+00 : f32
    %13 = vector.broadcast %cst_8 : f32 to vector<128x128xf32>
    %14 = arith.addf %13, %12 : vector<128x128xf32>
    %cst_9 = arith.constant 1.000000e+00 : f32
    %15 = vector.broadcast %cst_9 : f32 to vector<128x128xf32>
    %16 = arith.divf %15, %14 : vector<128x128xf32>
    %cst_10 = arith.constant 1.06140542 : f32
    %17 = vector.broadcast %cst_10 : f32 to vector<128x128xf32>
    %18 = arith.mulf %17, %16 : vector<128x128xf32>
    %cst_11 = arith.constant -1.45315206 : f32
    %19 = vector.broadcast %cst_11 : f32 to vector<128x128xf32>
    %20 = arith.addf %18, %19 : vector<128x128xf32>
    %21 = arith.mulf %20, %16 : vector<128x128xf32>
    %cst_12 = arith.constant 1.42141378 : f32
    %22 = vector.broadcast %cst_12 : f32 to vector<128x128xf32>
    %23 = arith.addf %21, %22 : vector<128x128xf32>
    %24 = arith.mulf %23, %16 : vector<128x128xf32>
    %cst_13 = arith.constant -0.284496725 : f32
    %25 = vector.broadcast %cst_13 : f32 to vector<128x128xf32>
    %26 = arith.addf %24, %25 : vector<128x128xf32>
    %27 = arith.mulf %26, %16 : vector<128x128xf32>
    %cst_14 = arith.constant 0.254829586 : f32
    %28 = vector.broadcast %cst_14 : f32 to vector<128x128xf32>
    %29 = arith.addf %27, %28 : vector<128x128xf32>
    %30 = arith.mulf %29, %16 : vector<128x128xf32>
    %cst_15 = arith.constant 0.000000e+00 : f32
    %31 = vector.broadcast %cst_15 : f32 to vector<128x128xf32>
    %32 = arith.subf %31, %10 : vector<128x128xf32>
    %33 = arith.mulf %32, %10 : vector<128x128xf32>
    %34 = math.exp %33 : vector<128x128xf32>
    %35 = arith.mulf %30, %34 : vector<128x128xf32>
    %cst_16 = arith.constant 1.000000e+00 : f32
    %36 = vector.broadcast %cst_16 : f32 to vector<128x128xf32>
    %37 = arith.subf %36, %35 : vector<128x128xf32>
    %cst_17 = arith.constant 0.000000e+00 : f32
    %38 = vector.broadcast %cst_17 : f32 to vector<128x128xf32>
    %39 = arith.cmpf olt, %9, %38 : vector<128x128xf32>
    %cst_18 = arith.constant 0.000000e+00 : f32
    %40 = vector.broadcast %cst_18 : f32 to vector<128x128xf32>
    %41 = arith.subf %40, %37 : vector<128x128xf32>
    %42 = arith.select %39, %41, %37 : vector<128x128xi1>, vector<128x128xf32>
    %cst_19 = arith.constant 1.000000e+00 : f32
    %43 = vector.broadcast %cst_19 : f32 to vector<128x128xf32>
    %44 = arith.addf %43, %42 : vector<128x128xf32>
    %45 = arith.mulf %7, %44 : vector<128x128xf32>
    %c0_20 = arith.constant 0 : index
    %c0_21 = arith.constant 0 : index
    %46 = vector.load %arg4[%c0_20, %c0_21] : memref<1x128xf32, #tpu.memory_space<vmem>>, vector<1x128xf32>
    %47 = vector.broadcast %46 : vector<1x128xf32> to vector<128x128xf32>
    %48 = arith.mulf %45, %47 : vector<128x128xf32>
    %cst_22 = arith.constant dense<0.000000e+00> : vector<128xf32>
    %49 = vector.multi_reduction <add>, %48, %cst_22 [1] : vector<128x128xf32> to vector<128xf32>
    %50 = vector.shape_cast %49 : vector<128xf32> to vector<128x1xf32>
    %c0_23 = arith.constant 0 : index
    %c0_24 = arith.constant 0 : index
    %51 = memref.load %arg5[%c0_23, %c0_24] : memref<1x1xf32, #tpu.memory_space<smem>>
    %52 = vector.broadcast %51 : f32 to vector<128x1xf32>
    %53 = arith.addf %50, %52 : vector<128x1xf32>
    %c0_25 = arith.constant 0 : index
    %c0_26 = arith.constant 0 : index
    %54 = vector.load %arg6[%c0_25, %c0_26] : memref<128x1xf32, #tpu.memory_space<vmem>>, vector<128x1xf32>
    tpu.vector_store %arg6[%c0_25, %c0_26], %53 {strides = array<i32>} : memref<128x1xf32, #tpu.memory_space<vmem>>, vector<128x1xf32>,
    return
  }
  func.func @transform_0(%arg0: i32) -> (i32, i32) {
    %c0_i32 = arith.constant 0 : i32
    %c0_i32_0 = arith.constant 0 : i32
    return %arg0, %c0_i32 : i32, i32
  }
  func.func @transform_1(%arg0: i32) -> (i32, i32) {
    %c0_i32 = arith.constant 0 : i32
    %c0_i32_0 = arith.constant 0 : i32
    %c0_i32_1 = arith.constant 0 : i32
    return %c0_i32, %c0_i32_0 : i32, i32
  }
  func.func @transform_2(%arg0: i32) -> (i32, i32) {
    %c0_i32 = arith.constant 0 : i32
    %c0_i32_0 = arith.constant 0 : i32
    %c0_i32_1 = arith.constant 0 : i32
    return %c0_i32, %c0_i32_0 : i32, i32
  }
  func.func @transform_3(%arg0: i32) -> (i32, i32) {
    %c0_i32 = arith.constant 0 : i32
    %c0_i32_0 = arith.constant 0 : i32
    %c0_i32_1 = arith.constant 0 : i32
    return %c0_i32, %c0_i32_0 : i32, i32
  }
  func.func @transform_4(%arg0: i32) -> (i32, i32) {
    %c0_i32 = arith.constant 0 : i32
    %c0_i32_0 = arith.constant 0 : i32
    %c0_i32_1 = arith.constant 0 : i32
    return %c0_i32, %c0_i32_0 : i32, i32
  }
  func.func @transform_5(%arg0: i32) -> (i32, i32) {
    %c0_i32 = arith.constant 0 : i32
    %c0_i32_0 = arith.constant 0 : i32
    return %arg0, %c0_i32 : i32, i32
  }
}

</mosaic_0001>

<bundles_post_ra>
// kernel: tpu_custom_call.1
= control target key start
LH: loop header
LB: loop body
LE: loop exit
PB: predicated region body
PF: predicated region fallthrough
CT: control target
= control target key end

     0   :  { %s2049_s0 = inlined_call_operand.hbm [shape: f32[256,256], index: 0, kind: input, shape index: {}]   ;;  %s2050_s1 = inlined_call_operand.hbm [shape: f32[256,128], index: 1, kind: input, shape index: {}]   ;;  %s2051_s2 = inlined_call_operand.vmem [shape: f32[1,128], index: 2, kind: input, shape index: {}]   ;;  %s2052_s3 = inlined_call_operand.vmem [shape: f32[1,128], index: 3, kind: input, shape index: {}]   ;;  %s2053_s4 = inlined_call_operand.<no memory space> [shape: f32[1,1], index: 4, kind: input, shape index: {}]   ;;  %s2054_s5 = inlined_call_operand.vmem [shape: f32[256,1], index: 5, kind: output, shape index: {}]  }
   0x1   :  { %10 = sst [smem:[#allocation2]] %s2053_s4 }
   0x2   :  { %11 = vsyncpa [#allocation4], 0 }
   0x3   :  { %13 = vsyncpa [#allocation4 + $0x1], 0 }
   0x4   :  { %14 = vsyncpa [#allocation6], 0  ;;  %s1462_s20 = smov 0   ;;  %s1464_s21 = smov 0  }
   0x5   :  { %s1466_s22 = smov 0   ;;  %s1468_s23 = smov 0  }
   0x6 LB: > { %s1079_s4 = sadd.s32 4294967295, %s1421_s23   ;;  %p40_p0 = scmp.ne.s32.totalorder %s1413_s21, %s1409_s20  ;;  %s1421_s23 = sphi %s1468_s23, %s2108_s23   ;;  %s1417_s22 = sphi %s1466_s22, %s2107_s22   ;;  %s1413_s21 = sphi %s1464_s21, %s2106_s21   ;;  %s1409_s20 = sphi %s1462_s20, %s2105_s20  }
   0x7   : > { %p1484_p1 = scmp.eq.s32.totalorder %s1079_s4, 0  ;;  %p1081_p2 = scmp.ge.s32.totalorder %s1421_s23, 1 }
   0x8   : > { %p161_p3 = scmp.lt.s32.totalorder %s1421_s23, 3  ;;  %s1423_s27 = smov [#allocation5]  }
   0x9   : > { %s2067_s24 = scalar_select %p1484_p1, 1, 0 }
   0xa   : > { %p1492_p4 = por %p1484_p1, %p40_p0  ;;  %p1496_p5 = pnand %p1081_p2, %p161_p3 }
   0xb   : > { %s173_s28 = sshll.u32 %s1423_s27, 4  ;;  %s1509_s30 = sadd.s32 1, %s1421_s23   ;;  %s174_s28 = int_to_ptr.vmem [resolvable:$true] %s173_s28 }
   0xc   : > { %s2068_s25 = scalar_select %p1492_p4, 1, 0 }
   0xd   : > { %s2069_s26 = scalar_select %p1496_p5, 1, 0 }
   0xe   : > { %p1217_p6 = pneg %p1496_p5  ;;  %s27_s6 = sadd.s32 1, %s1417_s22 }
   0xf   : > { %s24_s7 = ssub.s32 %s1421_s23, %s1509_s30  ;;  %s1340_s8 = scalar_lea.vmem %s174_s28, 4096 }
  0x10   : > { %p1504_p7 = pnand %p1217_p6, %p1484_p1  ;;  %p1341_p9 = scmp.ne.s32.totalorder %s174_s28, %s1340_s8 }
  0x11   : > { %p1348_p12 = scmp.lt.s32.totalorder %s174_s28, %s174_s28  ;;  %p1349_p13 = scmp.lt.s32.totalorder %s1340_s8, %s1340_s8 }
  0x12   : > { %p1331_p8 = pneg %p1504_p7 }
  0x13   : > { %p1350_p0 = por %p1349_p13, %p1348_p12 }
  0x14   : > { %p1343_p10 = pnand %p1341_p9, %p1331_p8 }
  0x16   : > { %p1344_p11 = pneg %p1343_p10 }
  0x18   : > { %p1351_p2 = pnand %p1350_p0, %p1344_p11 }
  0x1a   : > { %1354 = shalt.err (!%p1351_p2)
}
  0x1b   : > { %s1424_s9 = smov 128   ;;  %s1425_s10 = smov 8  }
  0x1c   : > { %1220 = dma.hbm_to_vmem [thread:$0]  (!%p1504_p7), %s2050_s1, 4096, %s174_s28, [#allocation6], %s1424_s9, %s1424_s9, %s1425_s10  }
  0x1d   : > { %p25_p3 = scmp.eq.s32.totalorder %s24_s7, 0  ;;  %p34_p6 = scmp.ne.s32.totalorder %s1417_s22, %s1413_s21 }
  0x1e   : > { %p35_p8 = scmp.eq.s32.totalorder %s1421_s23, 0  ;;  %p1226_p9 = scmp.lt.s32.totalorder %s1421_s23, 2 }
  0x1f   : > { %s1526_s13 = scalar_select %p25_p3, %s1417_s22, %s27_s6  }
  0x20   : > { %p36_p10 = por %p35_p8, %p34_p6  ;;  %s196_s14 = sand.u32 1, %s1417_s22  }
  0x21   : > { %s1084_s15 = sshll.u32 %s196_s14, 8  ;;  %s1098_s16 = sshll.u32 %s1421_s23, 12 }
  0x22   : > { %s1533_s19 = scalar_lea.hbm %s2049_s0, %s1098_s16  ;;  %s200_s20 = scalar_lea.vmem [#allocation3], %s1084_s15 }
  0x23   : > { %s208_s27 = sshll.u32 %s200_s20, 4  ;;  %p1537_p7 = pnand %p1226_p9, %p36_p10  ;;  %s1535_s27 = int_to_ptr.vmem [resolvable:$true] %s208_s27 }
  0x24   : > { %s1541_s29 = scalar_lea.sflag [#allocation4], %s196_s14  ;;  %s1355_s6 = scalar_lea.hbm %s1533_s19, 4096 }
  0x25   : > { %p1356_p11 = scmp.ne.s32.totalorder %s1533_s19, %s1355_s6  ;;  %p1357_p12 = pneg %p1537_p7 }
  0x26   : > { %s1360_s9 = scalar_lea.hbm %s2049_s0, 8192  ;;  %p1361_p2 = scmp.lt.s32.totalorder %s1533_s19, %s2049_s0 }
  0x27   : > { %p1358_p13 = pnand %p1357_p12, %p1356_p11  ;;  %p1362_p3 = scmp.lt.s32.totalorder %s1360_s9, %s1355_s6 }
  0x29   : > { %p1359_p0 = pneg %p1358_p13  ;;  %p1363_p6 = por %p1362_p3, %p1361_p2 }
  0x2b   : > { %p1364_p8 = pnand %p1363_p6, %p1359_p0 }
  0x2d   : > { %1367 = shalt.err (!%p1364_p8)
}
  0x2e   : > { %s1368_s12 = scalar_lea.vmem %s1535_s27, 4096  ;;  %s1426_s14 = smov [#allocation3]  }
  0x2f   : > { %p1369_p9 = scmp.ne.s32.totalorder %s1535_s27, %s1368_s12  ;;  %s1373_s15 = sshll.u32 %s1426_s14, 4  ;;  %s1374_s15 = int_to_ptr.vmem [resolvable:$false] %s1373_s15 }
  0x30   : > { %s1375_s16 = scalar_lea.vmem %s1374_s15, 8192  ;;  %p1376_p13 = scmp.lt.s32.totalorder %s1535_s27, %s1374_s15 }
  0x31   : > { %p1371_p10 = pnand %p1369_p9, %p1357_p12  ;;  %p1377_p1 = scmp.lt.s32.totalorder %s1375_s16, %s1368_s12 }
  0x33   : > { %p1372_p11 = pneg %p1371_p10  ;;  %p1378_p4 = por %p1377_p1, %p1376_p13 }
  0x35   : > { %p1379_p5 = pnand %p1378_p4, %p1372_p11 }
  0x37   : > { %1382 = shalt.err (!%p1379_p5)
}
  0x38   : > { %s1427_s17 = smov 256   ;;  %s1428_s18 = smov 16  }
  0x39   : > { %1224 = dma.hbm_to_vmem [thread:$0]  (!%p1537_p7), %s1533_s19, 4096, %s1535_s27, %s1541_s29, %s1427_s17, %s1427_s17, %s1428_s18  }
  0x3a   : > { %p2072_p12 = scmp.ne.s32.totalorder %s2069_s26, 0 }
  0x3c   : > { %220 = sbr.rel (%p2072_p12) target bundleno = 569 (0x239), region = 40 }
  0x41   : > { %s222_s20 = sand.u32 1, %s1413_s21   ;;  %p2073_p1 = scmp.ne.s32.totalorder %s2068_s25, 0 }
  0x42   : > { %s1089_s6 = sshll.u32 %s222_s20, 8  ;;  %s223_s7 = scalar_lea.sflag [#allocation4], %s222_s20 }
  0x43   : > { %s1565_s8 = scalar_lea.vmem [#allocation3], %s1089_s6 }
  0x44   : > { %1400 = dma.done.wait (%p2073_p1), %s223_s7, 4096  }
  0x45   : > { %1402 = vsyncadd (%p2073_p1), %s223_s7, 4294963200  ;;  %p2074_p4 = scmp.ne.s32.totalorder %s2067_s24, 0 }
  0x47   : > { %1404 = dma.done.wait (%p2074_p4), [#allocation6], 4096  }
  0x48   : > { %1406 = vsyncadd (%p2074_p4), [#allocation6], 4294963200  ;;  %v327_v0 = vld [vmem:[#allocation5 + $0xf8] sm:$0xff]  ;;  %v326_v2 = vld [vmem:[#allocation5 + $0xf0] sm:$0xff]  ;;  %s1091_s27 = sshll.u32 %s1079_s4, 4  ;;  %s967_s28 = sld [smem:[#allocation2]] }
  0x49   : > { %v311_v1 = vld [vmem:[#allocation5 + $0x78] sm:$0xff]  ;;  %1099 = vmatprep.subr.mxu0 %v327_v0  ;;  %1179 = vmatprep.subr.mxu1 %v327_v0  ;;  %v310_v3 = vld [vmem:[#allocation5 + $0x70] sm:$0xff]  ;;  %v325_v4 = vld [vmem:[#allocation5 + $0xe8] sm:$0xff]  ;;  %p259_p5 = scmp.lt.s32.totalorder %s1091_s27, 31 }
  0x4a   : > { %1100 = vmatpush3.msra.mxu0 %v311_v1  ;;  %1195 = vmatpush3.msra.mxu1 %v311_v1  ;;  %v309_v5 = vld [vmem:[#allocation5 + $0x68] sm:$0xff]  ;;  %v324_v6 = vld [vmem:[#allocation5 + $0xe0] sm:$0xff]  ;;  %v323_v8 = vld [vmem:[#allocation5 + $0xd8] sm:$0xff] }
  0x4b   : > { %1101 = vmatprep.subr.mxu0 %v326_v2  ;;  %1180 = vmatprep.subr.mxu1 %v326_v2  ;;  %v308_v7 = vld [vmem:[#allocation5 + $0x60] sm:$0xff]  ;;  %v307_v9 = vld [vmem:[#allocation5 + $0x58] sm:$0xff]  ;;  %v322_v10 = vld [vmem:[#allocation5 + $0xd0] sm:$0xff]  ;;  %s2110_s27 = smov (!%p259_p5, %s1091_s27), 31 }
  0x4c   : > { %1102 = vmatpush3.msra.mxu0 %v310_v3  ;;  %1196 = vmatpush3.msra.mxu1 %v310_v3  ;;  %v306_v11 = vld [vmem:[#allocation5 + $0x50] sm:$0xff]  ;;  %v321_v12 = vld [vmem:[#allocation5 + $0xc8] sm:$0xff]  ;;  %v320_v14 = vld [vmem:[#allocation5 + $0xc0] sm:$0xff]  ;;  %s1092_s29 = sshll.u32 %s2110_s27, 3 }
  0x4d   : > { %1103 = vmatprep.subr.mxu0 %v325_v4  ;;  %1181 = vmatprep.subr.mxu1 %v325_v4  ;;  %v305_v13 = vld [vmem:[#allocation5 + $0x48] sm:$0xff]  ;;  %v304_v15 = vld [vmem:[#allocation5 + $0x40] sm:$0xff]  ;;  %v319_v16 = vld [vmem:[#allocation5 + $0xb8] sm:$0xff]  ;;  %s2002_s11 = scalar_lea.vmem %s2054_s5, %s1092_s29 }
  0x4e   : > { %1104 = vmatpush3.msra.mxu0 %v309_v5  ;;  %1197 = vmatpush3.msra.mxu1 %v309_v5  ;;  %v303_v17 = vld [vmem:[#allocation5 + $0x38] sm:$0xff]  ;;  %v318_v18 = vld [vmem:[#allocation5 + $0xb0] sm:$0xff]  ;;  %v317_v20 = vld [vmem:[#allocation5 + $0xa8] sm:$0xff] }
  0x4f   : > { %1105 = vmatprep.subr.mxu0 %v324_v6  ;;  %1182 = vmatprep.subr.mxu1 %v324_v6  ;;  %v302_v19 = vld [vmem:[#allocation5 + $0x30] sm:$0xff]  ;;  %v301_v21 = vld [vmem:[#allocation5 + $0x28] sm:$0xff]  ;;  %v316_v22 = vld [vmem:[#allocation5 + $0xa0] sm:$0xff] }
  0x50   : > { %1106 = vmatpush3.msra.mxu0 %v308_v7  ;;  %1198 = vmatpush3.msra.mxu1 %v308_v7  ;;  %v300_v23 = vld [vmem:[#allocation5 + $0x20] sm:$0xff]  ;;  %v315_v24 = vld [vmem:[#allocation5 + $0x98] sm:$0xff]  ;;  %v314_v26 = vld [vmem:[#allocation5 + $0x90] sm:$0xff] }
  0x51   : > { %1107 = vmatprep.subr.mxu0 %v323_v8  ;;  %1183 = vmatprep.subr.mxu1 %v323_v8  ;;  %v299_v25 = vld [vmem:[#allocation5 + $0x18] sm:$0xff]  ;;  %v298_v27 = vld [vmem:[#allocation5 + $0x10] sm:$0xff]  ;;  %v313_v28 = vld [vmem:[#allocation5 + $0x88] sm:$0xff] }
  0x52   : > { %1108 = vmatpush3.msra.mxu0 %v307_v9  ;;  %1199 = vmatpush3.msra.mxu1 %v307_v9  ;;  %v297_v29 = vld [vmem:[#allocation5 + $0x8] sm:$0xff]  ;;  %v312_v30 = vld [vmem:[#allocation5 + $0x80] sm:$0xff]  ;;  %v267_v36 = vld [vmem:[%s1565_s8 + $0x18] sm:$0xff] }
  0x53   : > { %1109 = vmatprep.subr.mxu0 %v322_v10  ;;  %1184 = vmatprep.subr.mxu1 %v322_v10  ;;  %v296_v31 = vld [vmem:[#allocation5] sm:$0xff]  ;;  %v265_v32 = vld [vmem:[%s1565_s8 + $0x8] sm:$0xff]  ;;  %v283_v37 = vld [vmem:[%s1565_s8 + $0x98] sm:$0xff] }
  0x54   : > { %1110 = vmatpush3.msra.mxu0 %v306_v11  ;;  %1200 = vmatpush3.msra.mxu1 %v306_v11  ;;  %v281_v33 = vld [vmem:[%s1565_s8 + $0x88] sm:$0xff]  ;;  %v264_v34 = vld [vmem:[%s1565_s8] sm:$0xff]  ;;  %v266_v38 = vld [vmem:[%s1565_s8 + $0x10] sm:$0xff] }
  0x55   : > { %1111 = vmatprep.subr.mxu0 %v321_v12  ;;  %1185 = vmatprep.subr.mxu1 %v321_v12  ;;  %v280_v35 = vld [vmem:[%s1565_s8 + $0x80] sm:$0xff]  ;;  %v282_v39 = vld [vmem:[%s1565_s8 + $0x90] sm:$0xff]  ;;  %v269_v40 = vld [vmem:[%s1565_s8 + $0x28] sm:$0xff] }
  0x56   : > { %1112 = vmatpush3.msra.mxu0 %v305_v13  ;;  %1201 = vmatpush3.msra.mxu1 %v305_v13  ;;  %v285_v41 = vld [vmem:[%s1565_s8 + $0xa8] sm:$0xff]  ;;  %v268_v42 = vld [vmem:[%s1565_s8 + $0x20] sm:$0xff]  ;;  %v271_v44 = vld [vmem:[%s1565_s8 + $0x38] sm:$0xff] }
  0x57   : > { %1113 = vmatprep.subr.mxu0 %v320_v14  ;;  %1186 = vmatprep.subr.mxu1 %v320_v14  ;;  %v284_v43 = vld [vmem:[%s1565_s8 + $0xa0] sm:$0xff]  ;;  %v287_v45 = vld [vmem:[%s1565_s8 + $0xb8] sm:$0xff]  ;;  %v270_v46 = vld [vmem:[%s1565_s8 + $0x30] sm:$0xff] }
  0x58   : > { %1114 = vmatpush3.msra.mxu0 %v304_v15  ;;  %1202 = vmatpush3.msra.mxu1 %v304_v15  ;;  %v286_v47 = vld [vmem:[%s1565_s8 + $0xb0] sm:$0xff]  ;;  %v273_v48 = vld [vmem:[%s1565_s8 + $0x48] sm:$0xff]  ;;  %v272_v50 = vld [vmem:[%s1565_s8 + $0x40] sm:$0xff] }
  0x59   : > { %1115 = vmatprep.subr.mxu0 %v319_v16  ;;  %1187 = vmatprep.subr.mxu1 %v319_v16  ;;  %v289_v49 = vld [vmem:[%s1565_s8 + $0xc8] sm:$0xff]  ;;  %v288_v51 = vld [vmem:[%s1565_s8 + $0xc0] sm:$0xff]  ;;  %v275_v52 = vld [vmem:[%s1565_s8 + $0x58] sm:$0xff] }
  0x5a   : > { %1116 = vmatpush3.msra.mxu0 %v303_v17  ;;  %1203 = vmatpush3.msra.mxu1 %v303_v17  ;;  %v291_v53 = vld [vmem:[%s1565_s8 + $0xd8] sm:$0xff]  ;;  %v274_v54 = vld [vmem:[%s1565_s8 + $0x50] sm:$0xff]  ;;  %v277_v56 = vld [vmem:[%s1565_s8 + $0x68] sm:$0xff] }
  0x5b   : > { %1117 = vmatprep.subr.mxu0 %v318_v18  ;;  %1188 = vmatprep.subr.mxu1 %v318_v18  ;;  %v290_v55 = vld [vmem:[%s1565_s8 + $0xd0] sm:$0xff]  ;;  %v293_v57 = vld [vmem:[%s1565_s8 + $0xe8] sm:$0xff]  ;;  %v276_v58 = vld [vmem:[%s1565_s8 + $0x60] sm:$0xff] }
  0x5c   : > { %1118 = vmatpush3.msra.mxu0 %v302_v19  ;;  %1204 = vmatpush3.msra.mxu1 %v302_v19  ;;  %v292_v59 = vld [vmem:[%s1565_s8 + $0xe0] sm:$0xff]  ;;  %v279_v60 = vld [vmem:[%s1565_s8 + $0x78] sm:$0xff]  ;;  %v278_v62 = vld [vmem:[%s1565_s8 + $0x70] sm:$0xff] }
  0x5d   : > { %1119 = vmatprep.subr.mxu0 %v317_v20  ;;  %1189 = vmatprep.subr.mxu1 %v317_v20  ;;  %v295_v61 = vld [vmem:[%s1565_s8 + $0xf8] sm:$0xff]  ;;  %v294_v63 = vld [vmem:[%s1565_s8 + $0xf0] sm:$0xff]  ;;  %v1610_v2 = vld [vmem:[%s2051_s2] ss:$0 sm:$0xff] }
  0x5e   : > { %1120 = vmatpush3.msra.mxu0 %v301_v21  ;;  %1205 = vmatpush3.msra.mxu1 %v301_v21 }
  0x5f   : > { %1121 = vmatprep.subr.mxu0 %v316_v22  ;;  %1190 = vmatprep.subr.mxu1 %v316_v22 }
  0x60   : > { %1122 = vmatpush3.msra.mxu0 %v300_v23  ;;  %1206 = vmatpush3.msra.mxu1 %v300_v23 }
  0x61   : > { %1123 = vmatprep.subr.mxu0 %v315_v24  ;;  %1191 = vmatprep.subr.mxu1 %v315_v24 }
  0x62   : > { %1124 = vmatpush3.msra.mxu0 %v299_v25  ;;  %1207 = vmatpush3.msra.mxu1 %v299_v25 }
  0x63   : > { %1125 = vmatprep.subr.mxu0 %v314_v26  ;;  %1192 = vmatprep.subr.mxu1 %v314_v26 }
  0x64   : > { %1126 = vmatpush3.msra.mxu0 %v298_v27  ;;  %1208 = vmatpush3.msra.mxu1 %v298_v27 }
  0x65   : > { %1127 = vmatprep.subr.mxu0 %v313_v28  ;;  %1193 = vmatprep.subr.mxu1 %v313_v28 }
  0x66   : > { %1128 = vmatpush3.msra.mxu0 %v297_v29  ;;  %1209 = vmatpush3.msra.mxu1 %v297_v29 }
  0x67   : > { %1129 = vmatprep.subr.mxu0 %v312_v30  ;;  %1194 = vmatprep.subr.mxu1 %v312_v30 }
  0x68   : > { %1130 = vmatpush3.msra.mxu0 %v296_v31  ;;  %1210 = vmatpush3.msra.mxu1 %v296_v31 }
  0x69   : > { %399 = vmatprep.mubr.f32.mxu0 %v265_v32  ;;  %439 = vmatprep.mubr.f32.mxu1 %v281_v33 }
  0x6a   : > { %400 = vmatmul.mubr.f32.vlgmr.msra.gmra.mxu0 %v264_v34  ;;  %440 = vmatmul.mubr.f32.vlgmr.msra.gmra.mxu1 %v280_v35 }
  0x6b   : > { %404 = vmatprep.mubr.f32.mxu0 %v267_v36  ;;  %444 = vmatprep.mubr.f32.mxu1 %v283_v37 }
  0x6e   : > { %405 = vmatmul.mubr.f32.gmra.mxu0 %v266_v38  ;;  %445 = vmatmul.mubr.f32.gmra.mxu1 %v282_v39 }
  0x6f   : > { %409 = vmatprep.mubr.f32.mxu0 %v269_v40  ;;  %449 = vmatprep.mubr.f32.mxu1 %v285_v41 }
  0x72   : > { %410 = vmatmul.mubr.f32.gmra.mxu0 %v268_v42  ;;  %450 = vmatmul.mubr.f32.gmra.mxu1 %v284_v43 }
  0x73   : > { %414 = vmatprep.mubr.f32.mxu0 %v271_v44  ;;  %454 = vmatprep.mubr.f32.mxu1 %v287_v45 }
  0x76   : > { %415 = vmatmul.mubr.f32.gmra.mxu0 %v270_v46  ;;  %455 = vmatmul.mubr.f32.gmra.mxu1 %v286_v47 }
  0x77   : > { %419 = vmatprep.mubr.f32.mxu0 %v273_v48  ;;  %459 = vmatprep.mubr.f32.mxu1 %v289_v49 }
  0x7a   : > { %420 = vmatmul.mubr.f32.gmra.mxu0 %v272_v50  ;;  %460 = vmatmul.mubr.f32.gmra.mxu1 %v288_v51 }
  0x7b   : > { %424 = vmatprep.mubr.f32.mxu0 %v275_v52  ;;  %464 = vmatprep.mubr.f32.mxu1 %v291_v53 }
  0x7e   : > { %425 = vmatmul.mubr.f32.gmra.mxu0 %v274_v54  ;;  %465 = vmatmul.mubr.f32.gmra.mxu1 %v290_v55 }
  0x7f   : > { %429 = vmatprep.mubr.f32.mxu0 %v277_v56  ;;  %469 = vmatprep.mubr.f32.mxu1 %v293_v57 }
  0x82   : > { %430 = vmatmul.mubr.f32.gmra.mxu0 %v276_v58  ;;  %470 = vmatmul.mubr.f32.gmra.mxu1 %v292_v59 }
  0x83   : > { %434 = vmatprep.mubr.f32.mxu0 %v279_v60  ;;  %474 = vmatprep.mubr.f32.mxu1 %v295_v61 }
  0x86   : > { %435 = vmatmul.mubr.f32.gmra.mxu0 %v278_v62  ;;  %475 = vmatmul.mubr.f32.gmra.mxu1 %v294_v63 }
 0x12a   : > { %v1131_v0 = vpop.f32.mrf.mxu0  ;;  %v1155_v1 = vpop.f32.mrf.mxu1 }
 0x12c   : > { %v1132_v3 = vpop.f32.mrf.mxu0  ;;  %v1156_v4 = vpop.f32.mrf.mxu1 }
 0x12d   : > { %v1133_v5 = vadd.f32 %v1132_v3, %v1131_v0  ;;  %v1157_v6 = vadd.f32 %v1156_v4, %v1155_v1 }
 0x12e   : > { %v1134_v7 = vpop.f32.mrf.mxu0  ;;  %v1158_v8 = vpop.f32.mrf.mxu1 }
 0x12f   : > { %v1613_v9 = vadd.f32 %v1133_v5, %v1610_v2  ;;  %v1616_v10 = vadd.f32 %v1157_v6, %v1610_v2 }
 0x130   : > { %v1135_v11 = vpop.f32.mrf.mxu0  ;;  %v1159_v12 = vpop.f32.mrf.mxu1 }
 0x131   : > { %v1619_v13 = vmul.f32 0.70710677, %v1613_v9  ;;  %v1622_v14 = vmul.f32 0.70710677, %v1616_v10  ;;  %v1136_v15 = vadd.f32 %v1135_v11, %v1134_v7  ;;  %v1160_v16 = vadd.f32 %v1159_v12, %v1158_v8 }
 0x132   : > { %v1137_v17 = vpop.f32.mrf.mxu0  ;;  %v1161_v18 = vpop.f32.mrf.mxu1 }
 0x133   : > { %v512_v19 = vand.u32 2147483647, %v1619_v13  ;;  %v520_v20 = vand.u32 2147483647, %v1622_v14  ;;  %v1627_v21 = vadd.f32 %v1136_v15, %v1610_v2  ;;  %v1630_v22 = vadd.f32 %v1160_v16, %v1610_v2 }
 0x134   : > { %v1138_v23 = vpop.f32.mrf.mxu0  ;;  %v1162_v24 = vpop.f32.mrf.mxu1  ;;  %vm832_vm0 = vcmp.lt.f32.partialorder %v1619_v13, 0.0  ;;  %vm840_vm2 = vcmp.lt.f32.partialorder %v1622_v14, 0.0 }
 0x135   : > { %v736_v25 = vsub.f32 0.0, %v512_v19  ;;  %v744_v26 = vsub.f32 0.0, %v520_v20  ;;  %v1633_v27 = vmul.f32 0.70710677, %v1627_v21  ;;  %v1636_v28 = vmul.f32 0.70710677, %v1630_v22 }
 0x136   : > { %v1139_v29 = vadd.f32 %v1138_v23, %v1137_v17  ;;  %v1140_v30 = vpop.f32.mrf.mxu0  ;;  %v1164_v31 = vpop.f32.mrf.mxu1  ;;  %v528_v32 = vmul.f32 0.3275911, %v512_v19  ;;  %v536_v33 = vmul.f32 0.3275911, %v520_v20  ;;  %v1163_v40 = vadd.f32 %v1162_v24, %v1161_v18 }
 0x137   : > { %v513_v34 = vand.u32 2147483647, %v1633_v27  ;;  %v521_v35 = vand.u32 2147483647, %v1636_v28  ;;  %v752_v39 = vmul.f32 %v736_v25, %v512_v19  ;;  %v760_v41 = vmul.f32 %v744_v26, %v520_v20 }
 0x138   : > { %v1641_v36 = vadd.f32 %v1139_v29, %v1610_v2  ;;  %v1141_v37 = vpop.f32.mrf.mxu0  ;;  %v1165_v38 = vpop.f32.mrf.mxu1  ;;  %v544_v44 = vadd.f32 1.0, %v528_v32  ;;  %v552_v49 = vadd.f32 1.0, %v536_v33  ;;  %v1648_v54 = vadd.f32 %v1163_v40, %v1610_v2 }
 0x139   : > { %v737_v42 = vsub.f32 0.0, %v513_v34  ;;  %v529_v45 = vmul.f32 0.3275911, %v513_v34  ;;  %v745_v46 = vsub.f32 0.0, %v521_v35  ;;  %v537_v50 = vmul.f32 0.3275911, %v521_v35 }
 0x13a   : > { %v1143_v43 = vpop.f32.mrf.mxu0  ;;  %v1644_v47 = vmul.f32 0.70710677, %v1641_v36  ;;  %v1167_v48 = vpop.f32.mrf.mxu1  ;;  %v768_v51 = vmul.f32 1.442695, %v752_v39  ;;  %v784_v56 = vmul.f32 1.442695, %v760_v41  ;;  %v1142_v57 = vadd.f32 %v1141_v37, %v1140_v30 }
 0x13b   : > { %v753_v52 = vmul.f32 %v737_v42, %v513_v34  ;;  %v1166_v58 = vadd.f32 %v1165_v38, %v1164_v31  ;;  %1265 = vrcp.f32 %v544_v44  ;;  %v545_v59 = vadd.f32 1.0, %v529_v45 }
 0x13c   : > { %v514_v53 = vand.u32 2147483647, %v1644_v47  ;;  %v1144_v55 = vpop.f32.mrf.mxu0  ;;  %v761_v60 = vmul.f32 %v745_v46, %v521_v35  ;;  %v1168_v62 = vpop.f32.mrf.mxu1  ;;  %1267 = vrcp.f32 %v552_v49  ;;  %v553_v63 = vadd.f32 1.0, %v537_v50 }
 0x13d   : > { %v1651_v0 = vmul.f32 0.70710677, %v1648_v54  ;;  %v1654_v1 = vadd.f32 %v1142_v57, %v1610_v2  ;;  %1269 = vpow2.f32 %v768_v51  ;;  %v770_v3 = vmul.f32 1.442695, %v753_v52 }
 0x13e   : > { %v738_v61 = vsub.f32 0.0, %v514_v53  ;;  %v530_v4 = vmul.f32 0.3275911, %v514_v53  ;;  %v1657_v5 = vadd.f32 %v1166_v58, %v1610_v2  ;;  %v1146_v6 = vpop.f32.mrf.mxu0  ;;  %1271 = vpow2.f32 %v784_v56  ;;  %v1170_v16 = vpop.f32.mrf.mxu1 }
 0x13f   : > { %v522_v8 = vand.u32 2147483647, %v1651_v0  ;;  %v1661_v11 = vmul.f32 0.70710677, %v1654_v1  ;;  %1273 = vrcp.f32 %v545_v59  ;;  %v786_v12 = vmul.f32 1.442695, %v761_v60 }
 0x140   : > { %v754_v7 = vmul.f32 %v738_v61, %v514_v53  ;;  %v1664_v15 = vmul.f32 0.70710677, %v1657_v5  ;;  %1275 = vrcp.f32 %v553_v63  ;;  %v546_v20 = vadd.f32 1.0, %v530_v4  ;;  %v1147_v25 = vpop.f32.mrf.mxu0  ;;  %v1171_v37 = vpop.f32.mrf.mxu1 }
 0x141   : > { %v538_v17 = vmul.f32 0.3275911, %v522_v8  ;;  %v746_v18 = vsub.f32 0.0, %v522_v8  ;;  %v515_v19 = vand.u32 2147483647, %v1661_v11  ;;  %1277 = vpow2.f32 %v770_v3 }
 0x142   : > { %v523_v23 = vand.u32 2147483647, %v1664_v15  ;;  %v1145_v24 = vadd.f32 %v1144_v55, %v1143_v43  ;;  %v772_v26 = vmul.f32 1.442695, %v754_v7  ;;  %v1169_v35 = vadd.f32 %v1168_v62, %v1167_v48  ;;  %v1149_v42 = vpop.f32.mrf.mxu0  ;;  %v1173_v49 = vpop.f32.mrf.mxu1 }
 0x143   : > { %v762_v29 = vmul.f32 %v746_v18, %v522_v8  ;;  %v531_v30 = vmul.f32 0.3275911, %v515_v19  ;;  %v739_v31 = vsub.f32 0.0, %v515_v19  ;;  %v554_v32 = vadd.f32 1.0, %v538_v17 }
 0x144   : > { %v747_v33 = vsub.f32 0.0, %v523_v23  ;;  %v1669_v34 = vadd.f32 %v1145_v24, %v1610_v2  ;;  %1279 = vpow2.f32 %v786_v12  ;;  %v539_v39 = vmul.f32 0.3275911, %v523_v23  ;;  %v1150_v60 = vpop.f32.mrf.mxu0 }
 0x145   : > { %v755_v38 = vmul.f32 %v739_v31, %v515_v19  ;;  %1281 = vrcp.f32 %v546_v20  ;;  %v788_v40 = vmul.f32 1.442695, %v762_v29  ;;  %v547_v43 = vadd.f32 1.0, %v531_v30 }
 0x146   : > { %v1672_v41 = vmul.f32 0.70710677, %v1669_v34  ;;  %1283 = vpow2.f32 %v772_v26  ;;  %v1675_v44 = vadd.f32 %v1169_v35, %v1610_v2  ;;  %v1148_v45 = vadd.f32 %v1147_v25, %v1146_v6 }
 0x147   : > { %1285 = vrcp.f32 %v554_v32  ;;  %v763_v46 = vmul.f32 %v747_v33, %v523_v23  ;;  %v774_v51 = vmul.f32 1.442695, %v755_v38  ;;  %v555_v52 = vadd.f32 1.0, %v539_v39  ;;  %v1152_v32 = vpop.f32.mrf.mxu0 }
 0x148   : > { %v516_v48 = vand.u32 2147483647, %v1672_v41  ;;  %v1678_v50 = vpop.eup %1265  ;;  %v1681_v53 = vmul.f32 0.70710677, %v1675_v44  ;;  %v1684_v55 = vadd.f32 %v1148_v45, %v1610_v2  ;;  %1287 = vpow2.f32 %v788_v40 }
 0x149   : > { %v1686_v56 = vpop.eup %1267  ;;  %v1172_v59 = vadd.f32 %v1171_v37, %v1170_v16  ;;  %v1691_v62 = vmul.f32 0.5, %v1616_v10  ;;  %1289 = vrcp.f32 %v547_v43  ;;  %v1695_v3 = vmul.f32 0.5, %v1613_v9  ;;  %v1174_v16 = vpop.f32.mrf.mxu1 }
 0x14a   : > { %v532_v57 = vmul.f32 0.3275911, %v516_v48  ;;  %v740_v58 = vsub.f32 0.0, %v516_v48  ;;  %v1688_v61 = vpop.eup %1269  ;;  %v524_v63 = vand.u32 2147483647, %v1681_v53  ;;  %1291 = vpow2.f32 %v774_v51 }
 0x14b   : > { %v1697_v4 = vpop.eup %1271  ;;  %v790_v6 = vmul.f32 1.442695, %v763_v46  ;;  %v1700_v8 = vmul.f32 0.70710677, %v1684_v55  ;;  %v1703_v12 = vadd.f32 %v1172_v59, %v1610_v2  ;;  %v1151_v19 = vadd.f32 %v1150_v60, %v1149_v42  ;;  %v1176_v42 = vpop.f32.mrf.mxu1 }
 0x14c   : > { %v756_v7 = vmul.f32 %v740_v58, %v516_v48  ;;  %v1705_v17 = vpop.eup %1273  ;;  %v540_v10 = vmul.f32 0.3275911, %v524_v63  ;;  %v748_v18 = vsub.f32 0.0, %v524_v63  ;;  %v1710_v9 = vmul.f32 0.5, %v1627_v21 }
 0x14d   : > { %v1707_v20 = vpop.eup %1275  ;;  %1293 = vrcp.f32 %v555_v52  ;;  %v548_v23 = vadd.f32 1.0, %v532_v57  ;;  %v517_v24 = vand.u32 2147483647, %v1700_v8  ;;  %v1716_v30 = vmul.f32 0.70710677, %v1703_v12  ;;  %v1153_v57 = vpop.f32.mrf.mxu0 }
 0x14e   : > { %v1713_v25 = vpop.eup %1277  ;;  %v776_v26 = vmul.f32 1.442695, %v756_v7  ;;  %v764_v29 = vmul.f32 %v748_v18, %v524_v63  ;;  %v1175_v31 = vadd.f32 %v1174_v16, %v1173_v49  ;;  %v556_v33 = vadd.f32 1.0, %v540_v10  ;;  %v1177_v18 = vpop.f32.mrf.mxu1 }
 0x14f   : > { %v533_v35 = vmul.f32 0.3275911, %v517_v24  ;;  %v741_v37 = vsub.f32 0.0, %v517_v24  ;;  %v1719_v38 = vadd.f32 %v1151_v19, %v1610_v2  ;;  %v1722_v21 = vmul.f32 0.5, %v1641_v36 }
 0x150   : > { %1295 = vpow2.f32 %v790_v6  ;;  %v792_v39 = vmul.f32 1.442695, %v764_v29  ;;  %v525_v40 = vand.u32 2147483647, %v1716_v30  ;;  %v1733_v36 = vadd.f32 %v1175_v31, %v1610_v2 }
 0x151   : > { %2075 = vst [vmem:[#allocation9_spill] sm:$0xff] %v1719_v38  ;;  %v1725_v43 = vpop.eup %1279  ;;  %1297 = vrcp.f32 %v548_v23  ;;  %v549_v45 = vadd.f32 1.0, %v533_v35  ;;  %v757_v46 = vmul.f32 %v741_v37, %v517_v24  ;;  %v1728_v48 = vmul.f32 0.70710677, %v1719_v38 }
 0x152   : > { %v1730_v49 = vpop.eup %1281  ;;  %1299 = vpow2.f32 %v776_v26  ;;  %v541_v51 = vmul.f32 0.3275911, %v525_v40  ;;  %v749_v52 = vsub.f32 0.0, %v525_v40  ;;  %2077 = vst [vmem:[#allocation11_spill] sm:$0xff] %v1733_v36  ;;  %v1738_v59 = vmul.f32 0.5, %v1648_v54 }
 0x153   : > { %2076 = vst [vmem:[#allocation10_spill] sm:$0xff] %v1728_v48  ;;  %v1735_v58 = vpop.eup %1283  ;;  %1301 = vrcp.f32 %v556_v33  ;;  %v778_v60 = vmul.f32 1.442695, %v757_v46  ;;  %v518_v63 = vand.u32 2147483647, %v1728_v48  ;;  %v1154_v24 = vadd.f32 %v1153_v57, %v1152_v32 }
 0x154   : > { %v1741_v6 = vpop.eup %1285  ;;  %1303 = vpow2.f32 %v792_v39  ;;  %v557_v7 = vadd.f32 1.0, %v541_v51  ;;  %v765_v16 = vmul.f32 %v749_v52, %v525_v40  ;;  %v1744_v10 = vmul.f32 0.70710677, %v1733_v36 }
 0x155   : > { %1305 = vrcp.f32 %v549_v45  ;;  %v534_v19 = vmul.f32 0.3275911, %v518_v63  ;;  %v742_v23 = vsub.f32 0.0, %v518_v63  ;;  %v1746_v26 = vpop.eup %1287  ;;  %v1749_v54 = vmul.f32 0.5, %v1654_v1 }
 0x156   : > { %2078 = vst [vmem:[#allocation12_spill] sm:$0xff] %v1744_v10  ;;  %1307 = vpow2.f32 %v778_v60  ;;  %v794_v29 = vmul.f32 1.442695, %v765_v16  ;;  %v526_v31 = vand.u32 2147483647, %v1744_v10  ;;  %v1752_v33 = vpop.eup %1289  ;;  %v1755_v39 = vadd.f32 %v1154_v24, %v1610_v2 }
 0x157   : > { %v550_v35 = vadd.f32 1.0, %v534_v19  ;;  %v758_v37 = vmul.f32 %v742_v23, %v518_v63  ;;  %v1178_v40 = vadd.f32 %v1177_v18, %v1176_v42  ;;  %1309 = vrcp.f32 %v557_v7  ;;  %v1758_v51 = vpop.eup %1291 }
 0x158   : > { %2079 = vst [vmem:[#allocation13_spill] sm:$0xff] %v1755_v39  ;;  %v542_v45 = vmul.f32 0.3275911, %v526_v31  ;;  %v750_v32 = vsub.f32 0.0, %v526_v31  ;;  %v592_v46 = vmul.f32 1.0614054, %v1678_v50  ;;  %1311 = vpow2.f32 %v794_v29 }
 0x159   : > { %v1761_v1 = vmul.f32 0.5, %v1657_v5  ;;  %v780_v52 = vmul.f32 1.442695, %v758_v37  ;;  %v1764_v57 = vmul.f32 0.70710677, %v1755_v39  ;;  %v1769_v42 = vadd.f32 %v1178_v40, %v1610_v2 }
 0x15a   : > { %v1766_v60 = vpop.eup %1293  ;;  %v558_v63 = vadd.f32 1.0, %v542_v45  ;;  %v766_v16 = vmul.f32 %v750_v32, %v526_v31  ;;  %v608_v7 = vadd.f32 -1.4531521, %v592_v46  ;;  %v1772_v18 = vmul.f32 0.5, %v1669_v34 }
 0x15b   : > { %2080 = vst [vmem:[#allocation14_spill] sm:$0xff] %v1764_v57  ;;  %2081 = vst [vmem:[#allocation15_spill] sm:$0xff] %v1769_v42  ;;  %v1775_v19 = vmul.f32 0.5, %v1675_v44  ;;  %1313 = vrcp.f32 %v550_v35  ;;  %v519_v5 = vand.u32 2147483647, %v1764_v57  ;;  %v1779_v23 = vmul.f32 0.5, %v1684_v55 }
 0x15c   : > { %2082 = vst [vmem:[#allocation16_spill] sm:$0xff] %v1772_v18  ;;  %1315 = vpow2.f32 %v780_v52  ;;  %v796_v24 = vmul.f32 1.442695, %v766_v16  ;;  %v1782_v29 = vmul.f32 0.70710677, %v1769_v42  ;;  %v624_v34 = vmul.f32 %v1678_v50, %v608_v7 }
 0x15d   : > { %2083 = vst [vmem:[#allocation17_spill] sm:$0xff] %v1775_v19  ;;  %2084 = vst [vmem:[#allocation18_spill] sm:$0xff] %v1779_v23  ;;  %v1784_v2 = vpop.eup %1295  ;;  %v535_v31 = vmul.f32 0.3275911, %v519_v5  ;;  %v743_v37 = vsub.f32 0.0, %v519_v5  ;;  %v1791_v35 = vmul.f32 0.5, %v1703_v12  ;;  %1317 = vrcp.f32 %v558_v63 }
 0x15e   : > { %2085 = vst [vmem:[#allocation19_spill] sm:$0xff] %v1782_v29  ;;  %v601_v44 = vmul.f32 1.0614054, %v1707_v20  ;;  %v1788_v40 = vpop.eup %1297  ;;  %v527_v55 = vand.u32 2147483647, %v1782_v29  ;;  %v1795_v45 = vmul.f32 0.5, %v1630_v22  ;;  %1319 = vpow2.f32 %v796_v24 }
 0x15f   : > { %2086 = vst [vmem:[#allocation20_spill] sm:$0xff] %v1791_v35  ;;  %v1797_v32 = vpop.eup %1299  ;;  %v551_v46 = vadd.f32 1.0, %v535_v31  ;;  %v759_v52 = vmul.f32 %v743_v37, %v519_v5  ;;  %v640_v16 = vadd.f32 1.4214138, %v624_v34  ;;  %v600_v12 = vmul.f32 1.0614054, %v1686_v56 }
 0x160   : > { %v617_v42 = vadd.f32 -1.4531521, %v601_v44  ;;  %v1799_v7 = vpop.eup %1301  ;;  %v543_v36 = vmul.f32 0.3275911, %v527_v55  ;;  %v751_v10 = vsub.f32 0.0, %v527_v55  ;;  %vm841_vm1 = vcmp.lt.f32.partialorder %v1636_v28, 0.0 }
 0x161   : > { %v1802_v35 = vpop.eup %1303  ;;  %1321 = vrcp.f32 %v551_v46  ;;  %v782_v63 = vmul.f32 1.442695, %v759_v52  ;;  %v656_v22 = vmul.f32 %v1678_v50, %v640_v16  ;;  %v616_v37 = vadd.f32 -1.4531521, %v600_v12 }
 0x162   : > { %2087 = vst [vmem:[#allocation21_spill] sm:$0xff] %v1802_v35  ;;  %v633_v29 = vmul.f32 %v1707_v20, %v617_v42  ;;  %v1806_v39 = vpop.eup %1305  ;;  %v559_v5 = vadd.f32 1.0, %v543_v36  ;;  %v767_v31 = vmul.f32 %v751_v10, %v527_v55  ;;  %v594_v34 = vmul.f32 1.0614054, %v1730_v49 }
 0x163   : > { %v1809_v24 = vpop.eup %1307  ;;  %1323 = vpow2.f32 %v782_v63  ;;  %v672_v44 = vadd.f32 -0.28449672, %v656_v22  ;;  %v593_v19 = vmul.f32 1.0614054, %v1705_v17  ;;  %v632_v52 = vmul.f32 %v1686_v56, %v616_v37 }
 0x164   : > { %v649_v57 = vadd.f32 1.4214138, %v633_v29  ;;  %1325 = vrcp.f32 %v559_v5  ;;  %v798_v46 = vmul.f32 1.442695, %v767_v31  ;;  %v610_v16 = vadd.f32 -1.4531521, %v594_v34  ;;  %v1813_v42 = vpop.eup %1309 }
 0x165   : > { %v688_v36 = vmul.f32 %v1678_v50, %v672_v44  ;;  %v609_v55 = vadd.f32 -1.4531521, %v593_v19  ;;  %v595_v12 = vmul.f32 1.0614054, %v1752_v33  ;;  %v1818_v48 = vpop.eup %1311  ;;  %v648_v29 = vadd.f32 1.4214138, %v632_v52 }
 0x166   : > { %v665_v10 = vmul.f32 %v1707_v20, %v649_v57  ;;  %2088 = vst [vmem:[#allocation22_spill] sm:$0xff] %v1818_v48  ;;  %1327 = vpow2.f32 %v798_v46  ;;  %v626_v63 = vmul.f32 %v1730_v49, %v610_v16  ;;  %v602_v22 = vmul.f32 1.0614054, %v1741_v6 }
 0x167   : > { %v704_v5 = vadd.f32 0.2548296, %v688_v36  ;;  %v625_v37 = vmul.f32 %v1705_v17, %v609_v55  ;;  %v611_v34 = vadd.f32 -1.4531521, %v595_v12  ;;  %v664_v57 = vmul.f32 %v1686_v56, %v648_v29 }
 0x168   : > { %v681_v31 = vadd.f32 -0.28449672, %v665_v10  ;;  %v1823_v23 = vpop.eup %1313  ;;  %v642_v19 = vadd.f32 1.4214138, %v626_v63  ;;  %v618_v44 = vadd.f32 -1.4531521, %v602_v22 }
 0x169   : > { %v603_v46 = vmul.f32 1.0614054, %v1766_v60  ;;  %v1828_v52 = vpop.eup %1315  ;;  %v720_v16 = vmul.f32 %v1678_v50, %v704_v5  ;;  %v641_v10 = vadd.f32 1.4214138, %v625_v37  ;;  %v627_v55 = vmul.f32 %v1752_v33, %v611_v34 }
 0x16a   : > { %2089 = vst [vmem:[#allocation23_spill] sm:$0xff] %v1828_v52  ;;  %v697_v36 = vmul.f32 %v1707_v20, %v681_v31  ;;  %v680_v12 = vadd.f32 -0.28449672, %v664_v57  ;;  %v658_v38 = vmul.f32 %v1730_v49, %v642_v19  ;;  %v634_v48 = vmul.f32 %v1741_v6, %v618_v44  ;;  %v1835_v29 = vpop.eup %1317 }
 0x16b   : > { %v619_v18 = vadd.f32 -1.4531521, %v603_v46  ;;  %v800_v63 = vmul.f32 %v1688_v61, %v720_v16  ;;  %v657_v52 = vmul.f32 %v1705_v17, %v641_v10  ;;  %v643_v35 = vadd.f32 1.4214138, %v627_v55  ;;  %v1842_v34 = vpop.eup %1319 }
 0x16c   : > { %v713_v22 = vadd.f32 0.2548296, %v697_v36  ;;  %v696_v50 = vmul.f32 %v1686_v56, %v680_v12  ;;  %v674_v5 = vadd.f32 -0.28449672, %v658_v38  ;;  %v650_v31 = vadd.f32 1.4214138, %v634_v48 }
 0x16d   : > { %v635_v37 = vmul.f32 %v1766_v60, %v619_v18  ;;  %v816_v57 = vsub.f32 1.0, %v800_v63  ;;  %v673_v44 = vadd.f32 -0.28449672, %v657_v52  ;;  %v659_v61 = vmul.f32 %v1752_v33, %v643_v35 }
 0x16e   : > { %v729_v19 = vmul.f32 %v1707_v20, %v713_v22  ;;  %v1846_v46 = vpop.eup %1321  ;;  %v712_v16 = vadd.f32 0.2548296, %v696_v50  ;;  %v690_v36 = vmul.f32 %v1730_v49, %v674_v5  ;;  %v666_v10 = vmul.f32 %v1741_v6, %v650_v31 }
 0x16f   : > { %v651_v55 = vadd.f32 1.4214138, %v635_v37  ;;  %v848_v38 = vsub.f32 0.0, %v816_v57  ;;  %v689_v18 = vmul.f32 %v1705_v17, %v673_v44  ;;  %v675_v12 = vadd.f32 -0.28449672, %v659_v61 }
 0x170   : > { %v809_v48 = vmul.f32 %v1725_v43, %v729_v19  ;;  %v1853_v20 = vpop.eup %1323  ;;  %v728_v35 = vmul.f32 %v1686_v56, %v712_v16  ;;  %v706_v52 = vadd.f32 0.2548296, %v690_v36  ;;  %v682_v63 = vadd.f32 -0.28449672, %v666_v10  ;;  %v1867_v56 = vld [vmem:[%s2052_s3] ss:$0 sm:$0xff] }
 0x171   : > { %v667_v22 = vmul.f32 %v1766_v60, %v651_v55  ;;  %v1857_v50 = vpop.eup %1325  ;;  %vm834_vm3 = vcmp.lt.f32.partialorder %v1644_v47, 0.0  ;;  %v864_v5 = vsel %vm832_vm0, %v848_v38, %v816_v57  ;;  %v705_v43 = vadd.f32 0.2548296, %v689_v18 }
 0x172   : > { %v825_v31 = vsub.f32 1.0, %v809_v48  ;;  %v691_v37 = vmul.f32 %v1752_v33, %v675_v12  ;;  %vm833_vm4 = vcmp.lt.f32.partialorder %v1633_v27, 0.0  ;;  %v880_v19 = vadd.f32 1.0, %v864_v5 }
 0x173   : > { %v808_v44 = vmul.f32 %v1697_v4, %v728_v35  ;;  %v722_v61 = vmul.f32 %v1730_v49, %v706_v52  ;;  %v698_v16 = vmul.f32 %v1741_v6, %v682_v63  ;;  %v1872_v13 = vpop.eup %1327  ;;  %v721_v36 = vmul.f32 %v1705_v17, %v705_v43 }
 0x174   : > { %v857_v57 = vsub.f32 0.0, %v825_v31  ;;  %v707_v10 = vadd.f32 0.2548296, %v691_v37  ;;  %v683_v55 = vadd.f32 -0.28449672, %v667_v22  ;;  %vm835_vm5 = vcmp.lt.f32.partialorder %v1661_v11, 0.0 }
 0x175   : > { %v896_v38 = vmul.f32 %v880_v19, %v1695_v3  ;;  %v824_v48 = vsub.f32 1.0, %v808_v44  ;;  %v802_v18 = vmul.f32 %v1735_v58, %v722_v61  ;;  %v714_v12 = vadd.f32 0.2548296, %v698_v16 }
 0x176   : > { %v873_v4 = vsel %vm841_vm1, %v857_v57, %v825_v31  ;;  %v801_v49 = vmul.f32 %v1713_v25, %v721_v36  ;;  %v723_v35 = vmul.f32 %v1752_v33, %v707_v10  ;;  %v699_v52 = vmul.f32 %v1766_v60, %v683_v55 }
 0x177   : > { %v919_v17 = vmul.f32 %v1867_v56, %v896_v38  ;;  %v889_v63 = vadd.f32 1.0, %v873_v4  ;;  %v856_v22 = vsub.f32 0.0, %v824_v48  ;;  %v818_v5 = vsub.f32 1.0, %v802_v18 }
 0x178   : > { %vm842_vm6 = vcmp.lt.f32.partialorder %v1651_v0, 0.0  ;;  %v817_v3 = vsub.f32 1.0, %v801_v49  ;;  %v803_v58 = vmul.f32 %v1758_v51, %v723_v35  ;;  %v730_v43 = vmul.f32 %v1741_v6, %v714_v12 }
 0x179   : > { %v715_v28 = vadd.f32 0.2548296, %v699_v52  ;;  %935 = vadd.xlane.f32.xlu0 %v919_v17  ;;  %v905_v25 = vmul.f32 %v889_v63, %v1795_v45  ;;  %v872_v33 = vsel %vm840_vm2, %v856_v22, %v824_v48  ;;  %v850_v31 = vsub.f32 0.0, %v818_v5 }
 0x17a   : > { %v596_v37 = vmul.f32 1.0614054, %v1788_v40  ;;  %vm843_vm7 = vcmp.lt.f32.partialorder %v1664_v15, 0.0  ;;  %v888_v19 = vadd.f32 1.0, %v872_v33  ;;  %v849_v44 = vsub.f32 0.0, %v817_v3 }
 0x17b   : > { %v819_v61 = vsub.f32 1.0, %v803_v58  ;;  %v810_v16 = vmul.f32 %v1746_v26, %v730_v43  ;;  %v928_v51 = vmul.f32 %v1867_v56, %v905_v25  ;;  %v866_v6 = vsel %vm834_vm3, %v850_v31, %v818_v5 }
 0x17c   : > { %v731_v45 = vmul.f32 %v1766_v60, %v715_v28  ;;  %v612_v57 = vadd.f32 -1.4531521, %v596_v37  ;;  %v904_v14 = vmul.f32 %v888_v19, %v1691_v62  ;;  %v882_v36 = vadd.f32 1.0, %v866_v6 }
 0x17d   : > { %v865_v10 = vsel %vm833_vm4, %v849_v44, %v817_v3  ;;  %v851_v55 = vsub.f32 0.0, %v819_v61  ;;  %953 = vadd.xlane.f32.xlu1 %v928_v51  ;;  %v826_v48 = vsub.f32 1.0, %v810_v16  ;;  %v597_v62 = vmul.f32 1.0614054, %v1806_v39 }
 0x17e   : > { %v881_v38 = vadd.f32 1.0, %v865_v10  ;;  %v811_v26 = vmul.f32 %v1784_v2, %v731_v45  ;;  %v628_v18 = vmul.f32 %v1788_v40, %v612_v57  ;;  %v927_v47 = vmul.f32 %v1867_v56, %v904_v14 }
 0x17f   : > { %v898_v12 = vmul.f32 %v882_v36, %v1722_v21  ;;  %v867_v60 = vsel %vm835_vm5, %v851_v55, %v819_v61  ;;  %v858_v49 = vsub.f32 0.0, %v826_v48  ;;  %v613_v17 = vadd.f32 -1.4531521, %v597_v62 }
 0x180   : > { %v897_v27 = vmul.f32 %v881_v38, %v1710_v9  ;;  %v883_v4 = vadd.f32 1.0, %v867_v60  ;;  %v827_v35 = vsub.f32 1.0, %v811_v26  ;;  %951 = vadd.xlane.f32.xlu0 %v927_v47  ;;  %v644_v2 = vadd.f32 1.4214138, %v628_v18 }
 0x181   : > { %v921_v52 = vmul.f32 %v1867_v56, %v898_v12  ;;  %v604_v63 = vmul.f32 1.0614054, %v1799_v7  ;;  %v874_v11 = vsel %vm842_vm6, %v858_v49, %v826_v48  ;;  %v629_v58 = vmul.f32 %v1806_v39, %v613_v17 }
 0x182   : > { %v920_v22 = vmul.f32 %v1867_v56, %v897_v27  ;;  %v899_v21 = vmul.f32 %v883_v4, %v1749_v54  ;;  %v859_v5 = vsub.f32 0.0, %v827_v35  ;;  %v890_v9 = vadd.f32 1.0, %v874_v11 }
 0x183   : > { %939 = vadd.xlane.f32.xlu1 %v921_v52  ;;  %v660_v3 = vmul.f32 %v1788_v40, %v644_v2  ;;  %v620_v43 = vadd.f32 -1.4531521, %v604_v63  ;;  %v605_v33 = vmul.f32 1.0614054, %v1813_v42  ;;  %v598_v54 = vmul.f32 1.0614054, %v1823_v23 }
 0x184   : > { %v922_v28 = vmul.f32 %v1867_v56, %v899_v21  ;;  %v875_v25 = vsel %vm843_vm7, %v859_v5, %v827_v35  ;;  %937 = vadd.xlane.f32.xlu0 %v920_v22  ;;  %v906_v0 = vmul.f32 %v890_v9, %v1738_v59  ;;  %v645_v19 = vadd.f32 1.4214138, %v629_v58 }
 0x185   : > { %v891_v31 = vadd.f32 1.0, %v875_v25  ;;  %v676_v37 = vadd.f32 -0.28449672, %v660_v3  ;;  %v636_v44 = vmul.f32 %v1799_v7, %v620_v43  ;;  %v621_v61 = vadd.f32 -1.4531521, %v605_v33 }
 0x186   : > { %v614_v16 = vadd.f32 -1.4531521, %v598_v54  ;;  %v599_v51 = vmul.f32 1.0614054, %v1846_v46  ;;  %v929_v15 = vmul.f32 %v1867_v56, %v906_v0  ;;  %v661_v57 = vmul.f32 %v1806_v39, %v645_v19 }
 0x187   : > { %941 = vadd.xlane.f32.xlu1 %v922_v28  ;;  %v907_v6 = vmul.f32 %v891_v31, %v1761_v1  ;;  %v692_v45 = vmul.f32 %v1788_v40, %v676_v37  ;;  %v652_v14 = vadd.f32 1.4214138, %v636_v44  ;;  %v637_v59 = vmul.f32 %v1813_v42, %v621_v61 }
 0x188   : > { %v630_v36 = vmul.f32 %v1823_v23, %v614_v16  ;;  %v615_v10 = vadd.f32 -1.4531521, %v599_v51  ;;  %955 = vadd.xlane.f32.xlu0 %v929_v15  ;;  %v677_v48 = vadd.f32 -0.28449672, %v661_v57  ;;  %v606_v26 = vmul.f32 1.0614054, %v1835_v29 }
 0x189   : > { %v930_v55 = vmul.f32 %v1867_v56, %v907_v6  ;;  %v708_v38 = vadd.f32 0.2548296, %v692_v45  ;;  %vm836_vm8 = vcmp.lt.f32.partialorder %v1672_v41, 0.0  ;;  %v668_v1 = vmul.f32 %v1799_v7, %v652_v14 }
 0x18a   : > { %v653_v18 = vadd.f32 1.4214138, %v637_v59  ;;  %v646_v47 = vadd.f32 1.4214138, %v630_v36  ;;  %v631_v12 = vmul.f32 %v1846_v46, %v615_v10  ;;  %v693_v62 = vmul.f32 %v1806_v39, %v677_v48  ;;  %v2091_v48 = vld [vmem:[#allocation16_spill] sm:$0xff] }
 0x18b   : > { %957 = vadd.xlane.f32.xlu1 %v930_v55  ;;  %v724_v60 = vmul.f32 %v1788_v40, %v708_v38  ;;  %v622_v27 = vadd.f32 -1.4531521, %v606_v26  ;;  %v607_v4 = vmul.f32 1.0614054, %v1857_v50  ;;  %v684_v49 = vadd.f32 -0.28449672, %v668_v1 }
 0x18c   : > { %v669_v35 = vmul.f32 %v1813_v42, %v653_v18  ;;  %v662_v52 = vmul.f32 %v1823_v23, %v646_v47  ;;  %v647_v2 = vadd.f32 1.4214138, %v631_v12  ;;  %v709_v63 = vadd.f32 0.2548296, %v693_v62  ;;  %v2092_v1 = vld [vmem:[#allocation22_spill] sm:$0xff]  ;;  %v2093_v47 = vld [vmem:[#allocation23_spill] sm:$0xff] }
 0x18d   : > { %v804_v17 = vmul.f32 %v1797_v32, %v724_v60  ;;  %v638_v22 = vmul.f32 %v1835_v29, %v622_v27  ;;  %v623_v21 = vadd.f32 -1.4531521, %v607_v4  ;;  %vm837_vm9 = vcmp.lt.f32.partialorder %v1700_v8, 0.0  ;;  %v2095_v8 = vld [vmem:[#allocation18_spill] sm:$0xff] }
 0x18e   : > { %v700_v40 = vmul.f32 %v1799_v7, %v684_v49  ;;  %v685_v11 = vadd.f32 -0.28449672, %v669_v35  ;;  %v678_v5 = vadd.f32 -0.28449672, %v662_v52  ;;  %v663_v9 = vmul.f32 %v1846_v46, %v647_v2 }
 0x18f   : > { %v820_v3 = vsub.f32 1.0, %v804_v17  ;;  %v725_v58 = vmul.f32 %v1806_v39, %v709_v63  ;;  %v654_v43 = vadd.f32 1.4214138, %v638_v22  ;;  %v639_v28 = vmul.f32 %v1857_v50, %v623_v21  ;;  %v2094_v22 = vld [vmem:[#allocation9_spill] sm:$0xff] }
 0x190   : > { %v716_v25 = vadd.f32 0.2548296, %v700_v40  ;;  %v701_v32 = vmul.f32 %v1813_v42, %v685_v11  ;;  %v694_v33 = vmul.f32 %v1823_v23, %v678_v5  ;;  %v679_v54 = vadd.f32 -0.28449672, %v663_v9 }
 0x191   : > { %vm844_vm10 = vcmp.lt.f32.partialorder %v1681_v53, 0.0  ;;  %v852_v0 = vsub.f32 0.0, %v820_v3  ;;  %v805_v31 = vmul.f32 %v1809_v24, %v725_v58  ;;  %v670_v37 = vmul.f32 %v1835_v29, %v654_v43  ;;  %v2090_v24 = vld [vmem:[#allocation21_spill] sm:$0xff]  ;;  %v2096_v43 = vld [vmem:[#allocation10_spill] sm:$0xff] }
 0x192   : > { %v655_v19 = vadd.f32 1.4214138, %v639_v28  ;;  %v732_v44 = vmul.f32 %v1799_v7, %v716_v25  ;;  %v717_v39 = vadd.f32 0.2548296, %v701_v32  ;;  %v710_v61 = vadd.f32 0.2548296, %v694_v33 }
 0x193   : > { %v695_v16 = vmul.f32 %v1846_v46, %v679_v54  ;;  %vm845_vm11 = vcmp.lt.f32.partialorder %v1716_v30, 0.0  ;;  %v868_v51 = vsel %vm836_vm8, %v852_v0, %v820_v3  ;;  %v821_v15 = vsub.f32 1.0, %v805_v31  ;;  %v2097_v25 = vld [vmem:[#allocation17_spill] sm:$0xff]  ;;  %v2098_v0 = vld [vmem:[#allocation14_spill] sm:$0xff]  ;;  %v2100_v30 = vld [vmem:[#allocation20_spill] sm:$0xff] }
 0x194   : > { %v686_v6 = vadd.f32 -0.28449672, %v670_v37  ;;  %v671_v45 = vmul.f32 %v1857_v50, %v655_v19  ;;  %v884_v57 = vadd.f32 1.0, %v868_v51  ;;  %v812_v14 = vmul.f32 %v2090_v24, %v732_v44  ;;  %v2099_v19 = vld [vmem:[#allocation13_spill] sm:$0xff] }
 0x195   : > { %v733_v59 = vmul.f32 %v1813_v42, %v717_v39  ;;  %v726_v7 = vmul.f32 %v1823_v23, %v710_v61  ;;  %v853_v36 = vsub.f32 0.0, %v821_v15  ;;  %v711_v10 = vadd.f32 0.2548296, %v695_v16 }
 0x196   : > { %v702_v55 = vmul.f32 %v1835_v29, %v686_v6  ;;  %v687_v38 = vadd.f32 -0.28449672, %v671_v45  ;;  %v900_v26 = vmul.f32 %v884_v57, %v2091_v48  ;;  %v828_v41 = vsub.f32 1.0, %v812_v14  ;;  %v2101_v45 = vld [vmem:[#allocation12_spill] sm:$0xff] }
 0x197   : > { %v813_v18 = vmul.f32 %v2092_v1, %v733_v59  ;;  %v806_v12 = vmul.f32 %v2093_v47, %v726_v7  ;;  %v869_v60 = vsel %vm837_vm9, %v853_v36, %v821_v15  ;;  %v727_v62 = vmul.f32 %v1846_v46, %v711_v10  ;;  %v2102_v7 = vld [vmem:[#allocation11_spill] sm:$0xff] }
 0x198   : > { %v718_v42 = vadd.f32 0.2548296, %v702_v55  ;;  %v703_v23 = vmul.f32 %v1857_v50, %v687_v38  ;;  %v923_v27 = vmul.f32 %v1867_v56, %v900_v26  ;;  %v885_v4 = vadd.f32 1.0, %v869_v60  ;;  %v2103_v10 = vld [vmem:[#allocation19_spill] sm:$0xff] }
 0x199   : > { %v860_v49 = vsub.f32 0.0, %v828_v41  ;;  %v829_v35 = vsub.f32 1.0, %v813_v18  ;;  %v822_v52 = vsub.f32 1.0, %v806_v12  ;;  %v807_v2 = vmul.f32 %v1853_v20, %v727_v62  ;;  %v2104_v26 = vld [vmem:[#allocation15_spill] sm:$0xff] }
 0x19a   : > { %v734_v17 = vmul.f32 %v1835_v29, %v718_v42  ;;  %v719_v63 = vadd.f32 0.2548296, %v703_v23  ;;  %v486_v21 = vmul.f32 0.5, %v2094_v22  ;;  %943 = vadd.xlane.f32.xlu0 %v923_v27  ;;  %v901_v40 = vmul.f32 %v885_v4, %v2095_v8 }
 0x19b   : > { %v876_v46 = vsel %vm844_vm10, %v860_v49, %v828_v41  ;;  %v861_v11 = vsub.f32 0.0, %v829_v35  ;;  %v854_v9 = vsub.f32 0.0, %v822_v52  ;;  %v823_v3 = vsub.f32 1.0, %v807_v2 }
 0x19c   : > { %v892_v5 = vadd.f32 1.0, %v876_v46  ;;  %v814_v58 = vmul.f32 %v1842_v34, %v734_v17  ;;  %vm838_vm12 = vcmp.lt.f32.partialorder %v2096_v43, 0.0  ;;  %v924_v20 = vmul.f32 %v1867_v56, %v901_v40 }
 0x19d   : > { %v877_v29 = vsel %vm845_vm11, %v861_v11, %v829_v35  ;;  %v735_v28 = vmul.f32 %v1857_v50, %v719_v63  ;;  %v870_v53 = vsel %vm838_vm12, %v854_v9, %v822_v52  ;;  %v855_v54 = vsub.f32 0.0, %v823_v3 }
 0x19e   : > { %v908_v32 = vmul.f32 %v892_v5, %v2097_v25  ;;  %v893_v33 = vadd.f32 1.0, %v877_v29  ;;  %vm839_vm13 = vcmp.lt.f32.partialorder %v2098_v0, 0.0  ;;  %945 = vadd.xlane.f32.xlu1 %v924_v20  ;;  %v886_v31 = vadd.f32 1.0, %v870_v53 }
 0x19f   : > { %v830_v37 = vsub.f32 1.0, %v814_v58  ;;  %v815_v34 = vmul.f32 %v1872_v13, %v735_v28  ;;  %v487_v44 = vmul.f32 0.5, %v2099_v19  ;;  %v871_v16 = vsel %vm839_vm13, %v855_v54, %v823_v3 }
 0x1a0   : > { %v931_v39 = vmul.f32 %v1867_v56, %v908_v32  ;;  %v909_v61 = vmul.f32 %v893_v33, %v2100_v30  ;;  %v902_v50 = vmul.f32 %v886_v31, %v486_v21  ;;  %v887_v51 = vadd.f32 1.0, %v871_v16 }
 0x1a1   : > { %v862_v15 = vsub.f32 0.0, %v830_v37  ;;  %v831_v6 = vsub.f32 1.0, %v815_v34  ;;  %vm846_vm14 = vcmp.lt.f32.partialorder %v2101_v45, 0.0  ;;  %v494_v36 = vmul.f32 0.5, %v2102_v7 }
 0x1a2   : > { %959 = vadd.xlane.f32.xlu0 %v931_v39  ;;  %v932_v57 = vmul.f32 %v1867_v56, %v909_v61  ;;  %v925_v24 = vmul.f32 %v1867_v56, %v902_v50  ;;  %v903_v14 = vmul.f32 %v887_v51, %v487_v44  ;;  %vm847_vm15 = vcmp.lt.f32.partialorder %v2103_v10, 0.0 }
 0x1a3   : > { %v878_v13 = vsel %vm846_vm14, %v862_v15, %v830_v37  ;;  %v863_v59 = vsub.f32 0.0, %v831_v6  ;;  %v495_v41 = vmul.f32 0.5, %v2104_v26  ;;  %v968_v62 = vstv %s967_s28 }
 0x1a4   : > { %961 = vadd.xlane.f32.xlu1 %v932_v57  ;;  %v894_v55 = vadd.f32 1.0, %v878_v13  ;;  %v926_v38 = vmul.f32 %v1867_v56, %v903_v14  ;;  %vm985_vm0 = vcmask 7168  }
 0x1a5   : > { %v879_v48 = vsel %vm847_vm15, %v863_v59, %v831_v6 }
 0x1a6   : > { %947 = vadd.xlane.f32.xlu0 %v925_v24  ;;  %v910_v1 = vmul.f32 %v894_v55, %v494_v36  ;;  %v895_v18 = vadd.f32 1.0, %v879_v48 }
 0x1a8   : > { %949 = vadd.xlane.f32.xlu1 %v926_v38  ;;  %v933_v47 = vmul.f32 %v1867_v56, %v910_v1  ;;  %v911_v12 = vmul.f32 %v895_v18, %v495_v41 }
 0x1aa   : > { %963 = vadd.xlane.f32.xlu0 %v933_v47  ;;  %v934_v60 = vmul.f32 %v1867_v56, %v911_v12 }
 0x1ac   : > { %965 = vadd.xlane.f32.xlu1 %v934_v60 }
 0x202   : > { %v936_v56 = vpop.xlane.xlu0 %935 }
 0x203   : > { %v969_v42 = vadd.f32 %v968_v62, %v936_v56 }
 0x205   : > { %986 = vst.msk [vmem:[%s2002_s11] sm:$0xff] %vm985_vm0, %v969_v42 }
 0x206   : > { %v954_v23 = vpop.xlane.xlu1 %953 }
 0x207   : > { %v978_v27 = vadd.f32 %v968_v62, %v954_v23 }
 0x209   : > { %995 = vst.msk [vmem:[%s2002_s11 + $0x48] sm:$0xff] %vm985_vm0, %v978_v27  ;;  %v952_v4 = vpop.xlane.xlu0 %951 }
 0x20a   : > { %v977_v49 = vadd.f32 %v968_v62, %v952_v4 }
 0x20c   : > { %v940_v35 = vpop.xlane.xlu1 %939  ;;  %994 = vst.msk [vmem:[%s2002_s11 + $0x40] sm:$0xff] %vm985_vm0, %v977_v49 }
 0x20d   : > { %v971_v52 = vadd.f32 %v968_v62, %v940_v35  ;;  %v938_v2 = vpop.xlane.xlu0 %937 }
 0x20e   : > { %v970_v17 = vadd.f32 %v968_v62, %v938_v2 }
 0x20f   : > { %988 = vst.msk [vmem:[%s2002_s11 + $0x10] sm:$0xff] %vm985_vm0, %v971_v52 }
 0x210   : > { %v942_v63 = vpop.xlane.xlu1 %941  ;;  %987 = vst.msk [vmem:[%s2002_s11 + $0x8] sm:$0xff] %vm985_vm0, %v970_v17 }
 0x211   : > { %v972_v22 = vadd.f32 %v968_v62, %v942_v63  ;;  %v956_v21 = vpop.xlane.xlu0 %955 }
 0x212   : > { %v979_v8 = vadd.f32 %v968_v62, %v956_v21 }
 0x213   : > { %989 = vst.msk [vmem:[%s2002_s11 + $0x18] sm:$0xff] %vm985_vm0, %v972_v22 }
 0x214   : > { %v958_v40 = vpop.xlane.xlu1 %957  ;;  %996 = vst.msk [vmem:[%s2002_s11 + $0x50] sm:$0xff] %vm985_vm0, %v979_v8 }
 0x215   : > { %v980_v46 = vadd.f32 %v968_v62, %v958_v40 }
 0x217   : > { %997 = vst.msk [vmem:[%s2002_s11 + $0x58] sm:$0xff] %vm985_vm0, %v980_v46 }
 0x223   : > { %v944_v11 = vpop.xlane.xlu0 %943 }
 0x224   : > { %v973_v5 = vadd.f32 %v968_v62, %v944_v11 }
 0x226   : > { %990 = vst.msk [vmem:[%s2002_s11 + $0x20] sm:$0xff] %vm985_vm0, %v973_v5 }
 0x227   : > { %v946_v9 = vpop.xlane.xlu1 %945 }
 0x228   : > { %v974_v3 = vadd.f32 %v968_v62, %v946_v9 }
 0x22a   : > { %991 = vst.msk [vmem:[%s2002_s11 + $0x28] sm:$0xff] %vm985_vm0, %v974_v3 }
 0x22b   : > { %v960_v58 = vpop.xlane.xlu0 %959 }
 0x22c   : > { %v981_v43 = vadd.f32 %v968_v62, %v960_v58 }
 0x22d   : > { %v962_v20 = vpop.xlane.xlu1 %961 }
 0x22e   : > { %998 = vst.msk [vmem:[%s2002_s11 + $0x60] sm:$0xff] %vm985_vm0, %v981_v43  ;;  %v982_v29 = vadd.f32 %v968_v62, %v962_v20 }
 0x22f   : > { %v948_v28 = vpop.xlane.xlu0 %947 }
 0x230   : > { %999 = vst.msk [vmem:[%s2002_s11 + $0x68] sm:$0xff] %vm985_vm0, %v982_v29  ;;  %v975_v25 = vadd.f32 %v968_v62, %v948_v28 }
 0x231   : > { %v950_v32 = vpop.xlane.xlu1 %949 }
 0x232   : > { %992 = vst.msk [vmem:[%s2002_s11 + $0x30] sm:$0xff] %vm985_vm0, %v975_v25  ;;  %v976_v33 = vadd.f32 %v968_v62, %v950_v32 }
 0x233   : > { %v964_v53 = vpop.xlane.xlu0 %963 }
 0x234   : > { %993 = vst.msk [vmem:[%s2002_s11 + $0x38] sm:$0xff] %vm985_vm0, %v976_v33  ;;  %v983_v54 = vadd.f32 %v968_v62, %v964_v53 }
 0x235   : > { %v966_v0 = vpop.xlane.xlu1 %965 }
 0x236   : > { %1000 = vst.msk [vmem:[%s2002_s11 + $0x70] sm:$0xff] %vm985_vm0, %v983_v54  ;;  %v984_v31 = vadd.f32 %v968_v62, %v966_v0 }
 0x238   : > { %1001 = vst.msk [vmem:[%s2002_s11 + $0x78] sm:$0xff] %vm985_vm0, %v984_v31 }
 0x239 PF: > { %p17_p7 = scmp.ge.s32.totalorder %s1509_s30, 4   ;;  %s2105_s20 = smov %s1413_s21 }
 0x23a   : > { %s2106_s21 = smov %s1417_s22  ;;  %s2107_s22 = smov %s1526_s13 }
 0x23b   : > { %s2108_s23 = smov %s1509_s30  ;;  %19 = sbr.rel (!%p17_p7) target bundleno = 6 (0x6), region = 84 }
 0x240   :  { %1024 = vsyncpa [#allocation4], 1 }
 0x241   :  { %1026 = vsyncpa [#allocation4 + $0x1], 1 }
 0x242   :  { %1027 = vsyncpa [#allocation6], 1 }

</bundles_post_ra>
